<compile_context>
chip_gen: v7x
topology: tpu7x:2x2x1
jax: 0.10.0
libtpu: 0.0.40
codegen_flags: <defaults>
</compile_context>

<pallas_src>
import jax
import jax.numpy as jnp
from jax.experimental import pallas as pl
from jax.experimental.pallas import tpu as pltpu


def _round_up(n, m):
    return ((n + m - 1) // m) * m


def _mlp_kernel(x_ref, w1_ref, b1_ref, w2t_ref, b2_ref, o_ref):
    """o = relu(x @ W1x + b1_eff) @ W2 + b2, specialized for out_dim == 1."""
    x = x_ref[...]          # (tile_b, in_dim)  — in_dim is tiny (1 here)
    w1 = w1_ref[...]        # (in_dim, hidden)
    # fc1: tiny contraction dim -> VPU broadcast multiply-accumulate.
    acc = x[:, 0:1] * w1[0:1, :] + b1_ref[...]          # (tile_b, hidden)
    for i in range(1, x.shape[1]):                      # static, in_dim is tiny
        acc = acc + x[:, i:i + 1] * w1[i:i + 1, :]
    h = jnp.maximum(acc, 0.0)
    # fc2 (out_dim == 1): VPU multiply + cross-lane reduction (free XLU slot).
    o = jnp.sum(h * w2t_ref[...], axis=-1, keepdims=True) + b2_ref[...]
    o_ref[...] = o.astype(o_ref.dtype)


@jax.jit
def preference_target_forward(x, preference, w1, b1, w2, b2):
    """Pallas forward: relu(cat(x, pref) @ W1 + b1) @ W2 + b2 (out_dim = 1)."""
    B, in_dim = x.shape
    hidden = w1.shape[1]
    out_dim = w2.shape[1]
    assert out_dim == 1, "PreferenceTargetNetwork.fc2 has a single output"

    # Fold the (batch-shared) preference into the fc1 bias once per call.
    w1_x = w1[:in_dim, :]                                # (in_dim, hidden)
    b1_eff = (preference @ w1[in_dim:, :] + b1)[None]    # (1, hidden)
    w2_t = w2.T                                          # (1, hidden)
    b2_r = b2[None, :]                                   # (1, 1)

    # Batch tile: large (amortize ~0.35 us/step) but >= 2 grid steps when
    # B > 8 so the "parallel" axis can shard across both v7x TensorCores.
    # Multiple of 8 = f32 sublane tile.
    tile_b = min(2048, _round_up(B, 8), _round_up(pl.cdiv(B, 2), 8))
    b_p = _round_up(B, tile_b)
    grid = (b_p // tile_b,)

    x_p = x if b_p == B else jnp.pad(x, ((0, b_p - B), (0, 0)))

    out_p = pl.pallas_call(
        _mlp_kernel,
        out_shape=jax.ShapeDtypeStruct((b_p, out_dim), x.dtype),
        grid_spec=pltpu.PrefetchScalarGridSpec(
            num_scalar_prefetch=0,
            grid=grid,
            in_specs=[
                pl.BlockSpec((tile_b, in_dim), lambda i: (i, 0)),   # x tile
                pl.BlockSpec((in_dim, hidden), lambda i: (0, 0)),   # W1 (resident)
                pl.BlockSpec((1, hidden), lambda i: (0, 0)),        # b1_eff (resident)
                pl.BlockSpec((1, hidden), lambda i: (0, 0)),        # W2^T (resident)
                pl.BlockSpec((1, out_dim), lambda i: (0, 0)),       # b2 (resident)
            ],
            out_specs=pl.BlockSpec((tile_b, out_dim), lambda i: (i, 0)),
        ),
        compiler_params=pltpu.CompilerParams(
            dimension_semantics=("parallel",),
        ),
    )(x_p, w1_x, b1_eff, w2_t, b2_r)

    return out_p[:B]


def _ref_forward(x, preference, w1, b1, w2, b2):
    comb = jnp.concatenate(
        [x, jnp.broadcast_to(preference[None, :], (x.shape[0], preference.shape[0]))],
        axis=1,
    )
    h = jnp.maximum(comb @ w1 + b1, 0.0)
    return h @ w2 + b2


if __name__ == "__main__":
    input_dim, preference_dim, hidden_dim = 1, 2, 10
    batch = 8

    key = jax.random.PRNGKey(0)
    k_x, k_p, k_w1, k_b1, k_w2, k_b2 = jax.random.split(key, 6)

    x = jax.random.normal(k_x, (batch, input_dim), dtype=jnp.float32)
    preference = jax.random.normal(k_p, (preference_dim,), dtype=jnp.float32)

    # Parameters in (in, out) layout; y = x @ W + b (same math as nn.Linear).
    fan_in1 = input_dim + preference_dim
    w1 = jax.random.uniform(k_w1, (fan_in1, hidden_dim), jnp.float32,
                            -1.0 / fan_in1 ** 0.5, 1.0 / fan_in1 ** 0.5)
    b1 = jax.random.uniform(k_b1, (hidden_dim,), jnp.float32,
                            -1.0 / fan_in1 ** 0.5, 1.0 / fan_in1 ** 0.5)
    w2 = jax.random.uniform(k_w2, (hidden_dim, 1), jnp.float32,
                            -1.0 / hidden_dim ** 0.5, 1.0 / hidden_dim ** 0.5)
    b2 = jax.random.uniform(k_b2, (1,), jnp.float32,
                            -1.0 / hidden_dim ** 0.5, 1.0 / hidden_dim ** 0.5)

    y = preference_target_forward(x, preference, w1, b1, w2, b2)
    y = jax.block_until_ready(y)

    y_ref = _ref_forward(x, preference, w1, b1, w2, b2)
    assert y.shape == (batch, 1) and y.dtype == jnp.float32
    assert bool(jnp.allclose(y, y_ref, atol=1e-5, rtol=1e-5))

    print("KERNEL_OK")
</pallas_src>

<mosaic_0001>
module attributes {stable_mosaic.version = 11 : i64} {
  func.func @_mlp_kernel(%arg0: i32, %arg1: memref<8x1xf32, #tpu.memory_space<vmem>>, %arg2: memref<1x10xf32, #tpu.memory_space<vmem>>, %arg3: memref<1x10xf32, #tpu.memory_space<vmem>>, %arg4: memref<1x10xf32, #tpu.memory_space<vmem>>, %arg5: memref<1x1xf32, #tpu.memory_space<vmem>>, %arg6: memref<8x1xf32, #tpu.memory_space<vmem>>) attributes {dimension_semantics = [#tpu.dimension_semantics<parallel>], iteration_bounds = array<i64: 1>, scalar_prefetch = 0 : i64, scratch_operands = 0 : i64, tpu.core_type = #tpu.core_type<tc>, window_params = [{transform_indices = @transform_0, window_bounds = array<i64: 8, 1>}, {pipeline_mode = #tpu.pipeline_mode<synchronous>, transform_indices = @transform_1, window_bounds = array<i64: 1, 10>}, {pipeline_mode = #tpu.pipeline_mode<synchronous>, transform_indices = @transform_2, window_bounds = array<i64: 1, 10>}, {pipeline_mode = #tpu.pipeline_mode<synchronous>, transform_indices = @transform_3, window_bounds = array<i64: 1, 10>}, {pipeline_mode = #tpu.pipeline_mode<synchronous>, transform_indices = @transform_4, window_bounds = array<i64: 1, 1>}, {transform_indices = @transform_5, window_bounds = array<i64: 8, 1>}]} {
    %c0 = arith.constant 0 : index
    %c0_0 = arith.constant 0 : index
    %0 = vector.load %arg1[%c0, %c0_0] : memref<8x1xf32, #tpu.memory_space<vmem>>, vector<8x1xf32>
    %c0_1 = arith.constant 0 : index
    %c0_2 = arith.constant 0 : index
    %1 = vector.load %arg2[%c0_1, %c0_2] : memref<1x10xf32, #tpu.memory_space<vmem>>, vector<1x10xf32>
    %2 = vector.broadcast %0 : vector<8x1xf32> to vector<8x10xf32>
    %3 = vector.broadcast %1 : vector<1x10xf32> to vector<8x10xf32>
    %4 = arith.mulf %2, %3 : vector<8x10xf32>
    %c0_3 = arith.constant 0 : index
    %c0_4 = arith.constant 0 : index
    %5 = vector.load %arg3[%c0_3, %c0_4] : memref<1x10xf32, #tpu.memory_space<vmem>>, vector<1x10xf32>
    %6 = vector.broadcast %5 : vector<1x10xf32> to vector<8x10xf32>
    %7 = arith.addf %4, %6 : vector<8x10xf32>
    %cst = arith.constant 0.000000e+00 : f32
    %8 = vector.broadcast %cst : f32 to vector<8x10xf32>
    %9 = arith.maximumf %7, %8 : vector<8x10xf32>
    %c0_5 = arith.constant 0 : index
    %c0_6 = arith.constant 0 : index
    %10 = vector.load %arg4[%c0_5, %c0_6] : memref<1x10xf32, #tpu.memory_space<vmem>>, vector<1x10xf32>
    %11 = vector.broadcast %10 : vector<1x10xf32> to vector<8x10xf32>
    %12 = arith.mulf %9, %11 : vector<8x10xf32>
    %cst_7 = arith.constant dense<0.000000e+00> : vector<8xf32>
    %13 = vector.multi_reduction <add>, %12, %cst_7 [1] : vector<8x10xf32> to vector<8xf32>
    %14 = vector.shape_cast %13 : vector<8xf32> to vector<8x1xf32>
    %c0_8 = arith.constant 0 : index
    %c0_9 = arith.constant 0 : index
    %15 = vector.load %arg5[%c0_8, %c0_9] : memref<1x1xf32, #tpu.memory_space<vmem>>, vector<1x1xf32>
    %16 = vector.broadcast %15 : vector<1x1xf32> to vector<8x1xf32>
    %17 = arith.addf %14, %16 : vector<8x1xf32>
    %c0_10 = arith.constant 0 : index
    %c0_11 = arith.constant 0 : index
    %18 = vector.load %arg6[%c0_10, %c0_11] : memref<8x1xf32, #tpu.memory_space<vmem>>, vector<8x1xf32>
    tpu.vector_store %arg6[%c0_10, %c0_11], %17 {strides = array<i32>} : memref<8x1xf32, #tpu.memory_space<vmem>>, vector<8x1xf32>,
    return
  }
  func.func @transform_0(%arg0: i32) -> (i32, i32) {
    %c0_i32 = arith.constant 0 : i32
    %c0_i32_0 = arith.constant 0 : i32
    return %arg0, %c0_i32 : i32, i32
  }
  func.func @transform_1(%arg0: i32) -> (i32, i32) {
    %c0_i32 = arith.constant 0 : i32
    %c0_i32_0 = arith.constant 0 : i32
    %c0_i32_1 = arith.constant 0 : i32
    return %c0_i32, %c0_i32_0 : i32, i32
  }
  func.func @transform_2(%arg0: i32) -> (i32, i32) {
    %c0_i32 = arith.constant 0 : i32
    %c0_i32_0 = arith.constant 0 : i32
    %c0_i32_1 = arith.constant 0 : i32
    return %c0_i32, %c0_i32_0 : i32, i32
  }
  func.func @transform_3(%arg0: i32) -> (i32, i32) {
    %c0_i32 = arith.constant 0 : i32
    %c0_i32_0 = arith.constant 0 : i32
    %c0_i32_1 = arith.constant 0 : i32
    return %c0_i32, %c0_i32_0 : i32, i32
  }
  func.func @transform_4(%arg0: i32) -> (i32, i32) {
    %c0_i32 = arith.constant 0 : i32
    %c0_i32_0 = arith.constant 0 : i32
    %c0_i32_1 = arith.constant 0 : i32
    return %c0_i32, %c0_i32_0 : i32, i32
  }
  func.func @transform_5(%arg0: i32) -> (i32, i32) {
    %c0_i32 = arith.constant 0 : i32
    %c0_i32_0 = arith.constant 0 : i32
    return %arg0, %c0_i32 : i32, i32
  }
}

</mosaic_0001>

<bundles_post_ra>
// kernel: preference_target_forward.1
= control target key start
LH: loop header
LB: loop body
LE: loop exit
PB: predicated region body
PF: predicated region fallthrough
CT: control target
= control target key end

     0   :  { %v77_v0 = vmov 0   ;;  %vm53_vm0 = vcmask 80896   ;;  %vm65_vm1 = vcmask 7168   ;;  %s126_s0 = inlined_call_operand.vmem [shape: f32[8,1], index: 0, kind: input, shape index: {}]   ;;  %s127_s4 = inlined_call_operand.<no memory space> [shape: f32[1,1], index: 4, kind: input, shape index: {}]   ;;  %s128_s1 = inlined_call_operand.vmem [shape: f32[1,10], index: 1, kind: input, shape index: {}]   ;;  %s129_s2 = inlined_call_operand.vmem [shape: f32[1,10], index: 2, kind: input, shape index: {}]   ;;  %s130_s3 = inlined_call_operand.vmem [shape: f32[1,10], index: 3, kind: input, shape index: {}]   ;;  %s131_s5 = inlined_call_operand.vmem [shape: f32[8,1], index: 5, kind: output, shape index: {}]  }
   0x1   :  { %76 = vset.pattern.permute.xlu0 %v77_v0  ;;  %v22_v1 = vld [vmem:[%s126_s0] sm:$0xff]  ;;  %v10_v2 = vstv %s127_s4 }
   0x2   :  { %26 = vperm.xlu0 %76, %v22_v1   ;;  %11 = vst [vmem:[#allocation2] sm:$0x1] %v10_v2  ;;  %v71_v3 = vld [vmem:[%s128_s1] ss:$0 sm:$0xff] }
   0x3   :  { %v72_v4 = vld [vmem:[%s129_s2] ss:$0 sm:$0xff] }
   0x4   :  { %v73_v8 = vld [vmem:[%s130_s3] ss:$0 sm:$0xff] }
   0x9   :  { %v74_v12 = vld [vmem:[#allocation2] ss:$0 sm:$0xff] }
  0x81   :  { %v27_v5 = vpop.permute.xlu0 %26 }
  0x82   :  { %v35_v6 = vmul.f32 %v71_v3, %v27_v5 }
  0x84   :  { %v43_v7 = vadd.f32 %v72_v4, %v35_v6 }
  0x86   :  { %v44_v9 = vmax.f32 %v43_v7, 0.0 }
  0x88   :  { %v52_v10 = vmul.f32 %v73_v8, %v44_v9 }
  0x8a   :  { %v54_v11 = vsel %vm53_vm0, %v52_v10, 0.0 }
  0x8b   :  { %55 = vadd.xlane.f32.xlu0 %v54_v11 }
 0x118   :  { %v56_v13 = vpop.xlane.xlu0 %55 }
 0x119   :  { %v64_v14 = vadd.f32 %v74_v12, %v56_v13 }
 0x11b   :  { %66 = vst.msk [vmem:[%s131_s5] sm:$0xff] %vm65_vm1, %v64_v14 }

</bundles_post_ra>
